<compile_context>
chip_gen: v7x
topology: tpu7x:2x2x1
jax: 0.10.0
libtpu: 0.0.40
codegen_flags: <defaults>
</compile_context>

<pallas_src>
import functools

import jax
import jax.numpy as jnp
from jax.experimental import pallas as pl
from jax.experimental.pallas import tpu as pltpu


def _round_up(x, m):
    return (x + m - 1) // m * m


def _vmem_capacity_bytes():
    try:
        return int(pltpu.get_tpu_info().vmem_capacity_bytes)
    except Exception:
        return 128 << 20  # conservative fallback (v5e/v6e physical VMEM)


def _patch_embed_kernel(x_ref, w_ref, b_ref, o_ref):
    # One TM-row tile: [TM, K_pad] @ [K_pad, E_pad] + [1, E_pad] -> [TM, E_pad]
    acc = jnp.dot(x_ref[...], w_ref[...], preferred_element_type=jnp.float32)
    o_ref[...] = (acc + b_ref[...]).astype(o_ref.dtype)


@functools.partial(
    jax.jit, static_argnames=("patch_size", "tile_m", "compute_dtype")
)
def patch_embed(x, conv_w, conv_b, patch_size, *, tile_m=2048, compute_dtype=None):
    """x: [B, C, H, W] (NCHW, matching PyTorch). Returns [B, num_patches, E]."""
    B, C, H, W = x.shape
    P = patch_size
    E = conv_w.shape[0]
    gh, gw = H // P, W // P
    num_patches = gh * gw
    out_dtype = x.dtype

    # --- glue: extract non-overlapping patches, flatten in (c, kh, kw) order.
    # With allow_input_fusion below XLA may fuse this producer into the
    # pallas_call operand read instead of materializing the patch matrix.
    # TODO(synk): fold the gather into the kernel itself (grid over (B, gh)
    # with an in-register (c,kh,kw)->K flatten) to guarantee zero extra HBM.
    xp = x.reshape(B, C, gh, P, gw, P)
    xp = jnp.transpose(xp, (0, 2, 4, 1, 3, 5))
    xp = xp.reshape(B * num_patches, C * P * P)

    # conv weight [E, C, P, P] -> [C*P*P, E]  (matches (c, kh, kw) flattening)
    w = conv_w.reshape(E, C * P * P).T
    b = conv_b.reshape(1, E).astype(jnp.float32)

    if compute_dtype is not None:
        xp = xp.astype(compute_dtype)
        w = w.astype(compute_dtype)

    M, K = xp.shape
    in_b = jnp.dtype(xp.dtype).itemsize
    w_b = jnp.dtype(w.dtype).itemsize
    out_b = jnp.dtype(out_dtype).itemsize

    # Lane-dense tiles: pad K and E up to multiples of 128 (zeros are inert).
    K_pad = _round_up(K, 128)
    E_pad = _round_up(E, 128)
    if K_pad != K:
        xp = jnp.pad(xp, ((0, 0), (0, K_pad - K)))
        w = jnp.pad(w, ((0, K_pad - K), (0, 0)))
    if E_pad != E:
        w = jnp.pad(w, ((0, 0), (0, E_pad - E)))
        b = jnp.pad(b, ((0, 0), (0, E_pad - E)))

    # --- tile-size selection sized against this generation's VMEM ----------
    sub = 16 if in_b < 4 else 8            # sublane packing for 16-bit inputs
    capacity = _vmem_capacity_bytes()
    budget = min(int(capacity * 0.70), 100 << 20)  # ~45 MiB on v7x, ~90 MiB on v5e/v6e
    # resident weight + bias (double-buffered by the default pipeline) + headroom
    fixed = 2 * (K_pad + 1) * E_pad * w_b + (4 << 20)
    # double-buffered input/output tiles + the (TM, E_pad) f32 dot temporary
    per_row = 2 * K_pad * in_b + 2 * E_pad * out_b + 4 * E_pad
    tm = max((budget - fixed) // per_row, 128)
    tm = max((tm // sub) * sub, sub)
    tm = min(tm, tile_m)
    TM = int(min(tm, _round_up(M, sub)))

    # No M padding: last block is partial; OOB rows are never written back.
    grid_m = pl.cdiv(M, TM)

    vmem_bytes = int(fixed + per_row * TM)
    vmem_bytes = int(min(max(vmem_bytes, 16 << 20), min(capacity, 128 << 20)))

    cost = pl.CostEstimate(
        flops=2 * M * K_pad * E_pad,
        transcendentals=0,
        bytes_accessed=(
            M * K_pad * in_b + K_pad * E_pad * w_b + E_pad * 4 + M * E_pad * out_b
        ),
    )

    # TODO(synk): single-buffer the constant weight/bias blocks via
    # pipeline_mode=pl.Buffered(1) once confirmed supported for the top-level
    # pallas_call pipeline (halves the resident-weight VMEM footprint).
    out = pl.pallas_call(
        _patch_embed_kernel,
        out_shape=jax.ShapeDtypeStruct((M, E_pad), out_dtype),
        grid_spec=pltpu.PrefetchScalarGridSpec(
            num_scalar_prefetch=0,
            grid=(grid_m,),
            in_specs=[
                pl.BlockSpec((TM, K_pad), lambda i: (i, 0)),     # pipelined patch tiles
                pl.BlockSpec((K_pad, E_pad), lambda i: (0, 0)),  # weight: VMEM-resident
                pl.BlockSpec((1, E_pad), lambda i: (0, 0)),      # bias:   VMEM-resident
            ],
            out_specs=pl.BlockSpec((TM, E_pad), lambda i: (i, 0)),
        ),
        compiler_params=pltpu.CompilerParams(
            dimension_semantics=("parallel",),   # independent M tiles -> megacore
            vmem_limit_bytes=vmem_bytes,
            allow_input_fusion=[True, False, False],  # fuse the patch gather into operand 0
        ),
        cost_estimate=cost,
    )(xp, w, b)

    if E_pad != E:
        out = out[:, :E]
    return out.reshape(B, num_patches, E)


if __name__ == "__main__":
    # Small shapes consistent with the module: img=16, patch=4, C=4, E=32, B=2.
    B, C, H, W = 2, 4, 16, 16
    P = 4
    E = 32

    key = jax.random.PRNGKey(0)
    kx, kw, kb = jax.random.split(key, 3)
    x = jax.random.normal(kx, (B, C, H, W), dtype=jnp.float32)
    # Deterministic synthetic conv params (shape matches nn.Conv2d(C, E, P, P)).
    conv_w = jax.random.normal(kw, (E, C, P, P), dtype=jnp.float32) * 0.02
    conv_b = jax.random.normal(kb, (E,), dtype=jnp.float32) * 0.02

    # Reference via lax conv (same semantics as nn.Conv2d with stride=P).
    ref = jax.lax.conv_general_dilated(
        x, conv_w, window_strides=(P, P), padding="VALID",
        dimension_numbers=("NCHW", "OIHW", "NCHW"),
    ) + conv_b.reshape(1, E, 1, 1)
    ref = ref.reshape(B, E, -1).transpose(0, 2, 1)  # flatten(2).transpose(1,2)

    # f32 path: strict check.
    out = patch_embed(x, conv_w, conv_b, P)
    jax.block_until_ready(out)
    assert out.shape == (B, (H // P) * (W // P), E)
    assert jnp.allclose(out, ref, atol=1e-4, rtol=1e-4)

    # Partial final M block (M=32, TM=24) exercises the no-pad edge handling.
    out_edge = patch_embed(x, conv_w, conv_b, P, tile_m=24)
    jax.block_until_ready(out_edge)
    assert jnp.allclose(out_edge, ref, atol=1e-4, rtol=1e-4)

    # bf16-input path (mem-bound win on v6e/v7x): f32 accumulation, looser tol.
    out_bf16 = patch_embed(x, conv_w, conv_b, P, compute_dtype=jnp.bfloat16)
    jax.block_until_ready(out_bf16)
    assert out_bf16.shape == (B, (H // P) * (W // P), E)
    assert jnp.allclose(out_bf16.astype(jnp.float32), ref, atol=3e-2, rtol=3e-2)

    print("KERNEL_OK")
</pallas_src>

<mosaic_0001>
module attributes {stable_mosaic.version = 11 : i64} {
  func.func @_patch_embed_kernel(%arg0: i32, %arg1: memref<32x128xf32, #tpu.memory_space<vmem>>, %arg2: memref<128x128xf32, #tpu.memory_space<vmem>>, %arg3: memref<1x128xf32, #tpu.memory_space<vmem>>, %arg4: memref<32x128xf32, #tpu.memory_space<vmem>>) attributes {dimension_semantics = [#tpu.dimension_semantics<parallel>], iteration_bounds = array<i64: 1>, scalar_prefetch = 0 : i64, scratch_operands = 0 : i64, tpu.core_type = #tpu.core_type<tc>, window_params = [{transform_indices = @transform_0, window_bounds = array<i64: 32, 128>}, {pipeline_mode = #tpu.pipeline_mode<synchronous>, transform_indices = @transform_1, window_bounds = array<i64: 128, 128>}, {pipeline_mode = #tpu.pipeline_mode<synchronous>, transform_indices = @transform_2, window_bounds = array<i64: 1, 128>}, {transform_indices = @transform_3, window_bounds = array<i64: 32, 128>}]} {
    %c0 = arith.constant 0 : index
    %c0_0 = arith.constant 0 : index
    %0 = vector.load %arg1[%c0, %c0_0] : memref<32x128xf32, #tpu.memory_space<vmem>>, vector<32x128xf32>
    %c0_1 = arith.constant 0 : index
    %c0_2 = arith.constant 0 : index
    %1 = vector.load %arg2[%c0_1, %c0_2] : memref<128x128xf32, #tpu.memory_space<vmem>>, vector<128x128xf32>
    %cst = arith.constant dense<0.000000e+00> : vector<32x128xf32>
    %2 = tpu.matmul %0, %1, %cst {dimension_numbers = #tpu.dot_dimension_numbers<[1], [0], [0], [1], [0, 0, 1, 1], [], []>} : vector<32x128xf32>, vector<128x128xf32>, vector<32x128xf32> -> vector<32x128xf32>
    %c0_3 = arith.constant 0 : index
    %c0_4 = arith.constant 0 : index
    %3 = vector.load %arg3[%c0_3, %c0_4] : memref<1x128xf32, #tpu.memory_space<vmem>>, vector<1x128xf32>
    %4 = vector.broadcast %3 : vector<1x128xf32> to vector<32x128xf32>
    %5 = arith.addf %2, %4 : vector<32x128xf32>
    %c0_5 = arith.constant 0 : index
    %c0_6 = arith.constant 0 : index
    %6 = vector.load %arg4[%c0_5, %c0_6] : memref<32x128xf32, #tpu.memory_space<vmem>>, vector<32x128xf32>
    tpu.vector_store %arg4[%c0_5, %c0_6], %5 {strides = array<i32>} : memref<32x128xf32, #tpu.memory_space<vmem>>, vector<32x128xf32>,
    return
  }
  func.func @transform_0(%arg0: i32) -> (i32, i32) {
    %c0_i32 = arith.constant 0 : i32
    %c0_i32_0 = arith.constant 0 : i32
    return %arg0, %c0_i32 : i32, i32
  }
  func.func @transform_1(%arg0: i32) -> (i32, i32) {
    %c0_i32 = arith.constant 0 : i32
    %c0_i32_0 = arith.constant 0 : i32
    %c0_i32_1 = arith.constant 0 : i32
    return %c0_i32, %c0_i32_0 : i32, i32
  }
  func.func @transform_2(%arg0: i32) -> (i32, i32) {
    %c0_i32 = arith.constant 0 : i32
    %c0_i32_0 = arith.constant 0 : i32
    %c0_i32_1 = arith.constant 0 : i32
    return %c0_i32, %c0_i32_0 : i32, i32
  }
  func.func @transform_3(%arg0: i32) -> (i32, i32) {
    %c0_i32 = arith.constant 0 : i32
    %c0_i32_0 = arith.constant 0 : i32
    return %arg0, %c0_i32 : i32, i32
  }
}

</mosaic_0001>

<bundles_post_ra>
// kernel: patch_embed.2
= control target key start
LH: loop header
LB: loop body
LE: loop exit
PB: predicated region body
PF: predicated region fallthrough
CT: control target
= control target key end

     0   :  { %s440_s0 = inlined_call_operand.vmem [shape: f32[128,128], index: 0, kind: input, shape index: {}]   ;;  %s441_s1 = inlined_call_operand.vmem [shape: f32[1,128], index: 1, kind: input, shape index: {}]   ;;  %s442_s2 = inlined_call_operand.vmem [shape: f32[32,64], index: 2, kind: input, shape index: {}]   ;;  %s443_s3 = inlined_call_operand.<no memory space> [shape: f32[], index: 3, kind: input, shape index: {}]   ;;  %s444_s4 = inlined_call_operand.hbm [shape: f32[32,128], index: 4, kind: output, shape index: {}]  }
   0x1   :  { %v355_v0 = vstv %s443_s3 }
   0x2   :  { %v59_v1 = vld [vmem:[%s440_s0] sm:$0xff]  ;;  %v60_v2 = vld [vmem:[%s440_s0 + $0x8] sm:$0xff]  ;;  %v61_v3 = vld [vmem:[%s440_s0 + $0x10] sm:$0xff]  ;;  %v18_v4 = vlaneseq }
   0x3   :  { %v249_v5 = vpack.c.bf16 %v60_v2, %v59_v1  ;;  %v62_v6 = vld [vmem:[%s440_s0 + $0x18] sm:$0xff]  ;;  %v63_v8 = vld [vmem:[%s440_s0 + $0x20] sm:$0xff]  ;;  %v64_v9 = vld [vmem:[%s440_s0 + $0x28] sm:$0xff] }
   0x4   :  { %v253_v7 = vpack.c.bf16 %v62_v6, %v61_v3  ;;  %v19_v10 = vand.u32 127, %v18_v4  ;;  %v257_v11 = vpack.c.bf16 %v64_v9, %v63_v8  ;;  %v17_v12 = vld [vmem:[%s442_s2] sm:$0xff]  ;;  %v188_v13 = vld [vmem:[%s442_s2 + $0x10] sm:$0xff]  ;;  %v66_v15 = vld [vmem:[%s440_s0 + $0x38] sm:$0xff] }
   0x5   :  { %250 = vmatprep.subr.bf16.mxu0 %v249_v5  ;;  %281 = vmatprep.subr.bf16.mxu1 %v249_v5  ;;  %v65_v14 = vld [vmem:[%s440_s0 + $0x30] sm:$0xff] }
   0x6   :  { %252 = vmatpush3.bf16.msra.mxu0 %v249_v5  ;;  %289 = vmatpush3.bf16.msra.mxu1 %v249_v5  ;;  %vm21_vm0 = vcmp.lt.s32.totalorder %v19_v10, 64 }
   0x7   :  { %254 = vmatprep.subr.bf16.mxu0 %v253_v7  ;;  %282 = vmatprep.subr.bf16.mxu1 %v253_v7  ;;  %v22_v16 = vsel %vm21_vm0, %v17_v12, %v355_v0  ;;  %v41_v17 = vsel %vm21_vm0, %v188_v13, %v355_v0 }
   0x8   :  { %10 = vsyncpa [#allocation8], 0  ;;  %243 = vmatprep.mubr.f32.mxu0 %v22_v16  ;;  %246 = vmatprep.mubr.f32.mxu1 %v41_v17  ;;  %v261_v18 = vpack.c.bf16 %v66_v15, %v65_v14  ;;  %v67_v19 = vld [vmem:[%s440_s0 + $0x40] sm:$0xff]  ;;  %v68_v20 = vld [vmem:[%s440_s0 + $0x48] sm:$0xff]  ;;  %s324_s30 = smov [#allocation7]  }
   0x9   :  { %v265_v21 = vpack.c.bf16 %v68_v20, %v67_v19  ;;  %v69_v22 = vld [vmem:[%s440_s0 + $0x50] sm:$0xff]  ;;  %v70_v23 = vld [vmem:[%s440_s0 + $0x58] sm:$0xff]  ;;  %v71_v25 = vld [vmem:[%s440_s0 + $0x60] sm:$0xff]  ;;  %s176_s5 = sshll.u32 %s324_s30, 4  ;;  %s177_s5 = int_to_ptr.vmem [resolvable:$true] %s176_s5 }
   0xa   :  { %256 = vmatpush3.bf16.msra.mxu0 %v253_v7  ;;  %290 = vmatpush3.bf16.msra.mxu1 %v253_v7  ;;  %v269_v24 = vpack.c.bf16 %v70_v23, %v69_v22  ;;  %v72_v26 = vld [vmem:[%s440_s0 + $0x68] sm:$0xff]  ;;  %v73_v28 = vld [vmem:[%s440_s0 + $0x70] sm:$0xff]  ;;  %v74_v29 = vld [vmem:[%s440_s0 + $0x78] sm:$0xff]  ;;  %p305_p1 = scmp.lt.s32.totalorder %s177_s5, %s177_s5 }
   0xb   :  { %258 = vmatprep.subr.bf16.mxu0 %v257_v11  ;;  %283 = vmatprep.subr.bf16.mxu1 %v257_v11  ;;  %v273_v27 = vpack.c.bf16 %v72_v26, %v71_v25  ;;  %v277_v30 = vpack.c.bf16 %v74_v29, %v73_v28  ;;  %v187_v31 = vld [vmem:[%s442_s2 + $0x8] sm:$0xff]  ;;  %v189_v32 = vld [vmem:[%s442_s2 + $0x18] sm:$0xff]  ;;  %v190_v35 = vld [vmem:[%s441_s1] ss:$0 sm:$0xff]  ;;  %s300_s2 = scalar_lea.vmem %s177_s5, 512 }
   0xc   :  { %v31_v33 = vsel %vm21_vm0, %v187_v31, %v355_v0  ;;  %v51_v34 = vsel %vm21_vm0, %v189_v32, %v355_v0  ;;  %p301_p0 = scmp.ne.s32.totalorder %s177_s5, %s300_s2  ;;  %p306_p2 = scmp.lt.s32.totalorder %s300_s2, %s300_s2 }
   0xe   :  { %260 = vmatpush3.bf16.msra.mxu0 %v257_v11  ;;  %291 = vmatpush3.bf16.msra.mxu1 %v257_v11  ;;  %p307_p3 = por %p306_p2, %p305_p1 }
   0xf   :  { %262 = vmatprep.subr.bf16.mxu0 %v261_v18  ;;  %284 = vmatprep.subr.bf16.mxu1 %v261_v18 }
  0x10   :  { %p308_p4 = pnand %p307_p3, %p301_p0 }
  0x12   :  { %264 = vmatpush3.bf16.msra.mxu0 %v261_v18  ;;  %292 = vmatpush3.bf16.msra.mxu1 %v261_v18 }
  0x13   :  { %266 = vmatprep.subr.bf16.mxu0 %v265_v21  ;;  %285 = vmatprep.subr.bf16.mxu1 %v265_v21 }
  0x16   :  { %268 = vmatpush3.bf16.msra.mxu0 %v265_v21  ;;  %293 = vmatpush3.bf16.msra.mxu1 %v265_v21 }
  0x17   :  { %270 = vmatprep.subr.bf16.mxu0 %v269_v24  ;;  %286 = vmatprep.subr.bf16.mxu1 %v269_v24 }
  0x1a   :  { %272 = vmatpush3.bf16.msra.mxu0 %v269_v24  ;;  %294 = vmatpush3.bf16.msra.mxu1 %v269_v24 }
  0x1b   :  { %274 = vmatprep.subr.bf16.mxu0 %v273_v27  ;;  %287 = vmatprep.subr.bf16.mxu1 %v273_v27 }
  0x1e   :  { %276 = vmatpush3.bf16.msra.mxu0 %v273_v27  ;;  %295 = vmatpush3.bf16.msra.mxu1 %v273_v27 }
  0x1f   :  { %278 = vmatprep.subr.bf16.mxu0 %v277_v30  ;;  %288 = vmatprep.subr.bf16.mxu1 %v277_v30 }
  0x22   :  { %280 = vmatpush3.bf16.msra.mxu0 %v277_v30  ;;  %296 = vmatpush3.bf16.msra.mxu1 %v277_v30 }
  0x25   :  { %244 = vmatmul.mubr.f32.vlgmr.msra.gmra.mrb[0].mxu0 %v31_v33  ;;  %247 = vmatmul.mubr.f32.vlgmr.msra.gmra.mrb[0].mxu1 %v51_v34 }
  0xf8   :  { %v245_v36 = vpop.f32.mrb[0].mxu0  ;;  %v248_v37 = vpop.f32.mrb[0].mxu1 }
  0xf9   :  { %v154_v38 = vadd.f32 %v245_v36, %v190_v35  ;;  %v164_v39 = vadd.f32 %v248_v37, %v190_v35  ;;  %v148_v40 = vpop.f32.mrb[1].mxu0  ;;  %v158_v41 = vpop.f32.mrb[1].mxu1 }
  0xfa   :  { %v149_v42 = vadd.f32 %v190_v35, %v148_v40  ;;  %v159_v43 = vadd.f32 %v190_v35, %v158_v41 }
  0xfb   :  { %168 = vst [vmem:[#allocation7 + $0x8] sm:$0xff] %v154_v38  ;;  %170 = vst [vmem:[#allocation7 + $0x18] sm:$0xff] %v164_v39 }
  0xfc   :  { %167 = vst [vmem:[#allocation7] sm:$0xff] %v149_v42  ;;  %169 = vst [vmem:[#allocation7 + $0x10] sm:$0xff] %v159_v43 }
  0xfd   :  { %311 = shalt.err (!%p308_p4)
}
  0xfe   :  { %s312_s7 = scalar_lea.hbm %s444_s4, 512 }
  0xff   :  { %p313_p5 = scmp.ne.s32.totalorder %s444_s4, %s312_s7  ;;  %p316_p6 = scmp.lt.u32.totalorder %s312_s7, %s444_s4 }
 0x101   :  { %p318_p7 = pnand %p316_p6, %p313_p5 }
 0x103   :  { %321 = shalt.err (!%p318_p7)
}
 0x104   :  { %s325_s12 = smov 128   ;;  %s326_s13 = smov 8  }
 0x105   :  { %182 = dma.vmem_to_hbm [thread:$0]  %s177_s5, 512, %s444_s4, [#allocation8], %s325_s12, %s325_s12, %s326_s13  }
 0x106   :  { %322 = dma.done.wait [#allocation8], 512  }
 0x107   :  { %323 = vsyncadd [#allocation8], 4294966784 }
 0x108   :  { %186 = vsyncpa [#allocation8], 1 }

</bundles_post_ra>
